<compile_context>
chip_gen: v6e
topology: v6e:2x2x1
jax: 0.10.0
libtpu: 0.0.40
codegen_flags: <defaults>
</compile_context>

<pallas_src>
import jax
import jax.numpy as jnp
from jax.experimental import pallas as pl
from jax.experimental.pallas import tpu as pltpu


def _round_up(x, m):
    return (x + m - 1) // m * m


def _vmem_capacity_bytes():
    """Physical VMEM per TensorCore; conservative 64 MiB (v7x-class) fallback."""
    try:
        info = pltpu.get_tpu_info()
        cap = getattr(info, "vmem_capacity_bytes", None)
        if cap:
            return int(cap)
    except Exception:
        pass
    return 64 * 1024 * 1024


# ---------------------------------------------------------------------------
# Tile kernel: one (batch b, lane-tile t) grid step.
# ---------------------------------------------------------------------------
def _make_attention_kernel(has_b, use_tahn, C):
    def kernel(*refs):
        if has_b:
            (w_ref_ref, b_ref_ref, w_d_ref, w_b_ref, b_db_ref, v_ref, q_ref,
             static_ref, dyn_d_ref, dyn_b_ref, e_out_ref, u_out_ref) = refs
        else:
            (w_ref_ref, b_ref_ref, w_d_ref, b_db_ref, v_ref, q_ref,
             static_ref, dyn_d_ref, e_out_ref, u_out_ref) = refs

        # Conv1d(kernel_size=1) == channel matmul.  All blocks are lane-dense
        # (tile is a multiple of 128); MXU with f32 accumulation.
        e = (
            jnp.dot(w_ref_ref[...], static_ref[0],
                    preferred_element_type=jnp.float32)
            + b_ref_ref[...]
        )
        d_ex = (
            jnp.dot(w_d_ref[...], dyn_d_ref[0],
                    preferred_element_type=jnp.float32)
            + b_db_ref[...]
        )
        if has_b:
            d_ex = d_ex + jnp.dot(w_b_ref[...], dyn_b_ref[0],
                                  preferred_element_type=jnp.float32)

        q = q_ref[0]                                    # (H, 1) -> lane broadcast
        act = jnp.tanh(e + q + d_ex)                    # (H, T), f32

        # v-reduction on VPU/XLU (idle behind the MXU matmuls) instead of a
        # 1-row MXU matmul.
        u = jnp.sum(v_ref[...] * act, axis=0, keepdims=True)   # (1, T)
        if use_tahn:
            # PyTorch source references an undefined self.tanh; implement the
            # evident intent: logits = C * tanh(u).
            u = C * jnp.tanh(u)

        e_out_ref[0] = e.astype(e_out_ref.dtype)
        u_out_ref[0] = u.astype(u_out_ref.dtype)

    return kernel


# ---------------------------------------------------------------------------
# Wrapper
# ---------------------------------------------------------------------------
def attention_forward(params, static_hidden, dynamic_hidden, decoder_hidden,
                      *, use_tahn=False, C=10.0, compute_dtype=jnp.float32):
    """params = (w_d, b_d, w_b, b_b, w_ref, b_ref, w_q, b_q, v)
       static_hidden: (B,H,N); dynamic_hidden = (dyn_d (B,H,N), dyn_b (B,H,N) or None);
       decoder_hidden: (B,H).  Returns (e (B,H,N), logits (B,N))."""
    w_d, b_d, w_b, b_b, w_ref, b_ref, w_q, b_q, v = params
    dyn_d, dyn_b = dynamic_hidden
    B, H, N = static_hidden.shape
    has_b = dyn_b is not None

    # ---- generation-aware tiling -------------------------------------------
    vmem_cap = _vmem_capacity_bytes()
    big_vmem = vmem_cap > 64 * 1024 * 1024                 # 128 MiB parts (v5e/v6e)
    blk_budget = (4 if big_vmem else 2) * 1024 * 1024      # per (H, tile) f32 block
    tile_cap = max(128, (blk_budget // (H * 4)) // 128 * 128)
    tile_target = 1024 if big_vmem else 512
    tile = min(tile_target, tile_cap, _round_up(N, 128))
    # Keep >=2 grid steps so ("parallel","parallel") can actually split work
    # across v7x's two TensorCores.
    if B * (_round_up(N, tile) // tile) < 2 and tile > 128:
        tile = max(128, tile // 2)
    n_pad = _round_up(N, tile)
    grid = (B, n_pad // tile)

    # ---- wrapper-side prep (pads only the lane dim; no transposes) ----------
    cdt = compute_dtype

    def pad_n(x):
        if n_pad != N:
            x = jnp.pad(x, ((0, 0), (0, 0), (0, n_pad - N)))
        return x.astype(cdt)

    static_p = pad_n(static_hidden)
    dyn_d_p = pad_n(dyn_d)

    # Query projection once, in plain XLA (tiny); fed per-batch to the kernel,
    # never broadcast into an (H, B*N) slab.
    q = (decoder_hidden @ w_q.T + b_q[:, 0]).astype(jnp.float32)      # (B, H)
    q3 = q[:, :, None]                                                # (B, H, 1)

    v_col = v.reshape(H, 1).astype(jnp.float32)                       # (H, 1)
    b_db = (b_d + b_b) if has_b else b_d                              # fused conv biases

    def const_spec(shape):                          # resident across the grid
        return pl.BlockSpec(shape, lambda b, t: (0, 0))
    # NOTE: for production-sized H on v7x, pin these with
    # pipeline_mode=pl.Buffered(1) to avoid double-buffered weight copies.

    lane_spec = pl.BlockSpec((1, H, tile), lambda b, t: (b, 0, t))    # streamed slabs
    q_spec = pl.BlockSpec((1, H, 1), lambda b, t: (b, 0, 0))          # per-batch query
    u_spec = pl.BlockSpec((1, 1, tile), lambda b, t: (b, 0, t))       # logits tile

    in_specs = [const_spec((H, H)), const_spec((H, 1)),               # project_ref
                const_spec((H, H))]                                   # project_d
    operands = [w_ref.astype(cdt), b_ref.astype(jnp.float32), w_d.astype(cdt)]
    if has_b:
        in_specs.append(const_spec((H, H)))                           # project_b
        operands.append(w_b.astype(cdt))
    in_specs += [const_spec((H, 1)), const_spec((H, 1)),              # fused bias, v
                 q_spec, lane_spec, lane_spec]                        # q, static, dyn_d
    operands += [b_db.astype(jnp.float32), v_col, q3, static_p, dyn_d_p]
    if has_b:
        in_specs.append(lane_spec)                                    # dyn_b
        operands.append(pad_n(dyn_b))

    kernel = _make_attention_kernel(has_b, bool(use_tahn), float(C))

    e_p, u_p = pl.pallas_call(
        kernel,
        out_shape=(
            jax.ShapeDtypeStruct((B, H, n_pad), jnp.float32),
            jax.ShapeDtypeStruct((B, 1, n_pad), jnp.float32),
        ),
        grid_spec=pltpu.PrefetchScalarGridSpec(
            num_scalar_prefetch=0,
            grid=grid,
            in_specs=in_specs,
            out_specs=[lane_spec, u_spec],
        ),
        compiler_params=pltpu.CompilerParams(
            dimension_semantics=("parallel", "parallel"),
            # ~25% headroom below physical VMEM for compiler scratch / pipeline.
            vmem_limit_bytes=vmem_cap * 3 // 4),
    )(*operands)

    e = e_p[:, :, :N]                 # (B, H, N)  -- plain slice, no transpose
    logits = u_p[:, 0, :N]            # (B, N)
    return e, logits


# ---------------------------------------------------------------------------
# Synthetic parameters + pure-JAX reference
# ---------------------------------------------------------------------------
def init_params(key, hidden_size):
    ks = jax.random.split(key, 9)
    s = 1.0 / jnp.sqrt(hidden_size)
    u = lambda k, shape: jax.random.uniform(k, shape, jnp.float32, -s, s)
    w_d = u(ks[0], (hidden_size, hidden_size)); b_d = u(ks[1], (hidden_size, 1))
    w_b = u(ks[2], (hidden_size, hidden_size)); b_b = u(ks[3], (hidden_size, 1))
    w_ref = u(ks[4], (hidden_size, hidden_size)); b_ref = u(ks[5], (hidden_size, 1))
    w_q = u(ks[6], (hidden_size, hidden_size)); b_q = u(ks[7], (hidden_size, 1))
    # PyTorch initialises v to zeros; use small random values so the logits
    # path is numerically exercised (shape matches nn.Parameter((1,1,H))).
    v = u(ks[8], (1, 1, hidden_size))
    return (w_d, b_d, w_b, b_b, w_ref, b_ref, w_q, b_q, v)


def reference_forward(params, static_hidden, dynamic_hidden, decoder_hidden,
                      *, use_tahn=False, C=10.0):
    w_d, b_d, w_b, b_b, w_ref, b_ref, w_q, b_q, v = params
    dyn_d, dyn_b = dynamic_hidden
    d_ex = jnp.einsum('oi,bin->bon', w_d, dyn_d) + b_d[None]
    if dyn_b is not None:
        d_ex = d_ex + jnp.einsum('oi,bin->bon', w_b, dyn_b) + b_b[None]
    e = jnp.einsum('oi,bin->bon', w_ref, static_hidden) + b_ref[None]
    q = decoder_hidden @ w_q.T + b_q[:, 0][None]
    act = jnp.tanh(e + q[:, :, None] + d_ex)
    u = jnp.einsum('h,bhn->bn', v[0, 0], act)
    logits = C * jnp.tanh(u) if use_tahn else u
    return e, logits


if __name__ == "__main__":
    B, H, N = 2, 32, 8
    key = jax.random.PRNGKey(0)
    kp, ks, kd, kb, kq = jax.random.split(key, 5)

    params = init_params(kp, H)
    static_hidden = jax.random.normal(ks, (B, H, N), jnp.float32)
    dyn_d = jax.random.normal(kd, (B, H, N), jnp.float32)
    dyn_b = jax.random.normal(kb, (B, H, N), jnp.float32)
    decoder_hidden = jax.random.normal(kq, (B, H), jnp.float32)

    # main path: dynamic_b present, use_tahn=False (module default)
    e, logits = attention_forward(params, static_hidden, (dyn_d, dyn_b), decoder_hidden)
    jax.block_until_ready((e, logits))
    e_ref, logits_ref = reference_forward(params, static_hidden, (dyn_d, dyn_b), decoder_hidden)
    assert e.shape == (B, H, N) and logits.shape == (B, N)
    assert jnp.allclose(e, e_ref, atol=1e-4, rtol=1e-4)
    assert jnp.allclose(logits, logits_ref, atol=1e-4, rtol=1e-4)

    # use_tahn=True branch (logits = C * tanh(u))
    _, logits_t = attention_forward(params, static_hidden, (dyn_d, dyn_b), decoder_hidden,
                                    use_tahn=True, C=10.0)
    _, logits_t_ref = reference_forward(params, static_hidden, (dyn_d, dyn_b), decoder_hidden,
                                        use_tahn=True, C=10.0)
    assert jnp.allclose(logits_t, logits_t_ref, atol=1e-4, rtol=1e-4)

    # dynamic_b_hidden is None branch (specialized kernel: no dyn_b stream, no W_b matmul)
    e_n, logits_n = attention_forward(params, static_hidden, (dyn_d, None), decoder_hidden)
    e_n_ref, logits_n_ref = reference_forward(params, static_hidden, (dyn_d, None), decoder_hidden)
    assert jnp.allclose(e_n, e_n_ref, atol=1e-4, rtol=1e-4)
    assert jnp.allclose(logits_n, logits_n_ref, atol=1e-4, rtol=1e-4)

    jax.block_until_ready((logits_t, logits_n))
    print("KERNEL_OK")
</pallas_src>

<mosaic_0001>
module attributes {stable_mosaic.version = 11 : i64} {
  func.func @kernel(%arg0: i32, %arg1: i32, %arg2: memref<32x32xf32, #tpu.memory_space<vmem>>, %arg3: memref<32x1xf32, #tpu.memory_space<vmem>>, %arg4: memref<32x32xf32, #tpu.memory_space<vmem>>, %arg5: memref<32x32xf32, #tpu.memory_space<vmem>>, %arg6: memref<32x1xf32, #tpu.memory_space<vmem>>, %arg7: memref<32x1xf32, #tpu.memory_space<vmem>>, %arg8: memref<1x32x1xf32, #tpu.memory_space<vmem>>, %arg9: memref<1x32x128xf32, #tpu.memory_space<vmem>>, %arg10: memref<1x32x128xf32, #tpu.memory_space<vmem>>, %arg11: memref<1x32x128xf32, #tpu.memory_space<vmem>>, %arg12: memref<1x32x128xf32, #tpu.memory_space<vmem>>, %arg13: memref<1x1x128xf32, #tpu.memory_space<vmem>>) attributes {dimension_semantics = [#tpu.dimension_semantics<parallel>, #tpu.dimension_semantics<parallel>], iteration_bounds = array<i64: 2, 1>, scalar_prefetch = 0 : i64, scratch_operands = 0 : i64, tpu.core_type = #tpu.core_type<tc>, window_params = [{pipeline_mode = #tpu.pipeline_mode<synchronous>, transform_indices = @transform_0, window_bounds = array<i64: 32, 32>}, {pipeline_mode = #tpu.pipeline_mode<synchronous>, transform_indices = @transform_1, window_bounds = array<i64: 32, 1>}, {pipeline_mode = #tpu.pipeline_mode<synchronous>, transform_indices = @transform_2, window_bounds = array<i64: 32, 32>}, {pipeline_mode = #tpu.pipeline_mode<synchronous>, transform_indices = @transform_3, window_bounds = array<i64: 32, 32>}, {pipeline_mode = #tpu.pipeline_mode<synchronous>, transform_indices = @transform_4, window_bounds = array<i64: 32, 1>}, {pipeline_mode = #tpu.pipeline_mode<synchronous>, transform_indices = @transform_5, window_bounds = array<i64: 32, 1>}, {transform_indices = @transform_6, window_bounds = array<i64: 1, 32, 1>}, {transform_indices = @transform_7, window_bounds = array<i64: 1, 32, 128>}, {transform_indices = @transform_8, window_bounds = array<i64: 1, 32, 128>}, {transform_indices = @transform_9, window_bounds = array<i64: 1, 32, 128>}, {transform_indices = @transform_10, window_bounds = array<i64: 1, 32, 128>}, {transform_indices = @transform_11, window_bounds = array<i64: 1, 1, 128>}]} {
    %c0 = arith.constant 0 : index
    %c0_0 = arith.constant 0 : index
    %0 = vector.load %arg2[%c0, %c0_0] : memref<32x32xf32, #tpu.memory_space<vmem>>, vector<32x32xf32>
    %c0_1 = arith.constant 0 : index
    %c0_2 = arith.constant 0 : index
    %c0_3 = arith.constant 0 : index
    %1 = vector.load %arg9[%c0_1, %c0_2, %c0_3] : memref<1x32x128xf32, #tpu.memory_space<vmem>>, vector<1x32x128xf32>
    %2 = vector.shape_cast %1 : vector<1x32x128xf32> to vector<32x128xf32>
    %cst = arith.constant dense<0.000000e+00> : vector<32x128xf32>
    %3 = tpu.matmul %0, %2, %cst {dimension_numbers = #tpu.dot_dimension_numbers<[1], [0], [0], [1], [0, 0, 1, 1], [], []>} : vector<32x32xf32>, vector<32x128xf32>, vector<32x128xf32> -> vector<32x128xf32>
    %c0_4 = arith.constant 0 : index
    %c0_5 = arith.constant 0 : index
    %4 = vector.load %arg3[%c0_4, %c0_5] : memref<32x1xf32, #tpu.memory_space<vmem>>, vector<32x1xf32>
    %5 = vector.broadcast %4 : vector<32x1xf32> to vector<32x128xf32>
    %6 = arith.addf %3, %5 : vector<32x128xf32>
    %c0_6 = arith.constant 0 : index
    %c0_7 = arith.constant 0 : index
    %7 = vector.load %arg4[%c0_6, %c0_7] : memref<32x32xf32, #tpu.memory_space<vmem>>, vector<32x32xf32>
    %c0_8 = arith.constant 0 : index
    %c0_9 = arith.constant 0 : index
    %c0_10 = arith.constant 0 : index
    %8 = vector.load %arg10[%c0_8, %c0_9, %c0_10] : memref<1x32x128xf32, #tpu.memory_space<vmem>>, vector<1x32x128xf32>
    %9 = vector.shape_cast %8 : vector<1x32x128xf32> to vector<32x128xf32>
    %cst_11 = arith.constant dense<0.000000e+00> : vector<32x128xf32>
    %10 = tpu.matmul %7, %9, %cst_11 {dimension_numbers = #tpu.dot_dimension_numbers<[1], [0], [0], [1], [0, 0, 1, 1], [], []>} : vector<32x32xf32>, vector<32x128xf32>, vector<32x128xf32> -> vector<32x128xf32>
    %c0_12 = arith.constant 0 : index
    %c0_13 = arith.constant 0 : index
    %11 = vector.load %arg6[%c0_12, %c0_13] : memref<32x1xf32, #tpu.memory_space<vmem>>, vector<32x1xf32>
    %12 = vector.broadcast %11 : vector<32x1xf32> to vector<32x128xf32>
    %13 = arith.addf %10, %12 : vector<32x128xf32>
    %c0_14 = arith.constant 0 : index
    %c0_15 = arith.constant 0 : index
    %14 = vector.load %arg5[%c0_14, %c0_15] : memref<32x32xf32, #tpu.memory_space<vmem>>, vector<32x32xf32>
    %c0_16 = arith.constant 0 : index
    %c0_17 = arith.constant 0 : index
    %c0_18 = arith.constant 0 : index
    %15 = vector.load %arg11[%c0_16, %c0_17, %c0_18] : memref<1x32x128xf32, #tpu.memory_space<vmem>>, vector<1x32x128xf32>
    %16 = vector.shape_cast %15 : vector<1x32x128xf32> to vector<32x128xf32>
    %cst_19 = arith.constant dense<0.000000e+00> : vector<32x128xf32>
    %17 = tpu.matmul %14, %16, %cst_19 {dimension_numbers = #tpu.dot_dimension_numbers<[1], [0], [0], [1], [0, 0, 1, 1], [], []>} : vector<32x32xf32>, vector<32x128xf32>, vector<32x128xf32> -> vector<32x128xf32>
    %18 = arith.addf %13, %17 : vector<32x128xf32>
    %c0_20 = arith.constant 0 : index
    %c0_21 = arith.constant 0 : index
    %c0_22 = arith.constant 0 : index
    %19 = vector.load %arg8[%c0_20, %c0_21, %c0_22] : memref<1x32x1xf32, #tpu.memory_space<vmem>>, vector<1x32x1xf32>
    %20 = vector.shape_cast %19 : vector<1x32x1xf32> to vector<32x1xf32>
    %21 = vector.broadcast %20 : vector<32x1xf32> to vector<32x128xf32>
    %22 = arith.addf %6, %21 : vector<32x128xf32>
    %23 = arith.addf %22, %18 : vector<32x128xf32>
    %24 = math.tanh %23 : vector<32x128xf32>
    %c0_23 = arith.constant 0 : index
    %c0_24 = arith.constant 0 : index
    %25 = vector.load %arg7[%c0_23, %c0_24] : memref<32x1xf32, #tpu.memory_space<vmem>>, vector<32x1xf32>
    %26 = vector.broadcast %25 : vector<32x1xf32> to vector<32x128xf32>
    %27 = arith.mulf %26, %24 : vector<32x128xf32>
    %cst_25 = arith.constant dense<0.000000e+00> : vector<128xf32>
    %28 = vector.multi_reduction <add>, %27, %cst_25 [0] : vector<32x128xf32> to vector<128xf32>
    %29 = vector.shape_cast %28 : vector<128xf32> to vector<1x128xf32>
    %c0_26 = arith.constant 0 : index
    %c0_27 = arith.constant 0 : index
    %c0_28 = arith.constant 0 : index
    %30 = vector.load %arg12[%c0_26, %c0_27, %c0_28] : memref<1x32x128xf32, #tpu.memory_space<vmem>>, vector<1x32x128xf32>
    %31 = vector.shape_cast %30 : vector<1x32x128xf32> to vector<32x128xf32>
    %32 = vector.shape_cast %6 : vector<32x128xf32> to vector<1x32x128xf32>
    tpu.vector_store %arg12[%c0_26, %c0_27, %c0_28], %32 {strides = array<i32>} : memref<1x32x128xf32, #tpu.memory_space<vmem>>, vector<1x32x128xf32>,
    %c0_29 = arith.constant 0 : index
    %c0_30 = arith.constant 0 : index
    %c0_31 = arith.constant 0 : index
    %33 = vector.load %arg13[%c0_29, %c0_30, %c0_31] : memref<1x1x128xf32, #tpu.memory_space<vmem>>, vector<1x1x128xf32>
    %34 = vector.shape_cast %33 : vector<1x1x128xf32> to vector<1x128xf32>
    %35 = vector.shape_cast %29 : vector<1x128xf32> to vector<1x1x128xf32>
    tpu.vector_store %arg13[%c0_29, %c0_30, %c0_31], %35 {strides = array<i32>} : memref<1x1x128xf32, #tpu.memory_space<vmem>>, vector<1x1x128xf32>,
    return
  }
  func.func @transform_0(%arg0: i32, %arg1: i32) -> (i32, i32) {
    %c0_i32 = arith.constant 0 : i32
    %c0_i32_0 = arith.constant 0 : i32
    %c0_i32_1 = arith.constant 0 : i32
    return %c0_i32, %c0_i32_0 : i32, i32
  }
  func.func @transform_1(%arg0: i32, %arg1: i32) -> (i32, i32) {
    %c0_i32 = arith.constant 0 : i32
    %c0_i32_0 = arith.constant 0 : i32
    %c0_i32_1 = arith.constant 0 : i32
    return %c0_i32, %c0_i32_0 : i32, i32
  }
  func.func @transform_2(%arg0: i32, %arg1: i32) -> (i32, i32) {
    %c0_i32 = arith.constant 0 : i32
    %c0_i32_0 = arith.constant 0 : i32
    %c0_i32_1 = arith.constant 0 : i32
    return %c0_i32, %c0_i32_0 : i32, i32
  }
  func.func @transform_3(%arg0: i32, %arg1: i32) -> (i32, i32) {
    %c0_i32 = arith.constant 0 : i32
    %c0_i32_0 = arith.constant 0 : i32
    %c0_i32_1 = arith.constant 0 : i32
    return %c0_i32, %c0_i32_0 : i32, i32
  }
  func.func @transform_4(%arg0: i32, %arg1: i32) -> (i32, i32) {
    %c0_i32 = arith.constant 0 : i32
    %c0_i32_0 = arith.constant 0 : i32
    %c0_i32_1 = arith.constant 0 : i32
    return %c0_i32, %c0_i32_0 : i32, i32
  }
  func.func @transform_5(%arg0: i32, %arg1: i32) -> (i32, i32) {
    %c0_i32 = arith.constant 0 : i32
    %c0_i32_0 = arith.constant 0 : i32
    %c0_i32_1 = arith.constant 0 : i32
    return %c0_i32, %c0_i32_0 : i32, i32
  }
  func.func @transform_6(%arg0: i32, %arg1: i32) -> (i32, i32, i32) {
    %c0_i32 = arith.constant 0 : i32
    %c0_i32_0 = arith.constant 0 : i32
    %c0_i32_1 = arith.constant 0 : i32
    return %arg0, %c0_i32, %c0_i32_0 : i32, i32, i32
  }
  func.func @transform_7(%arg0: i32, %arg1: i32) -> (i32, i32, i32) {
    %c0_i32 = arith.constant 0 : i32
    %c0_i32_0 = arith.constant 0 : i32
    return %arg0, %c0_i32, %arg1 : i32, i32, i32
  }
  func.func @transform_8(%arg0: i32, %arg1: i32) -> (i32, i32, i32) {
    %c0_i32 = arith.constant 0 : i32
    %c0_i32_0 = arith.constant 0 : i32
    return %arg0, %c0_i32, %arg1 : i32, i32, i32
  }
  func.func @transform_9(%arg0: i32, %arg1: i32) -> (i32, i32, i32) {
    %c0_i32 = arith.constant 0 : i32
    %c0_i32_0 = arith.constant 0 : i32
    return %arg0, %c0_i32, %arg1 : i32, i32, i32
  }
  func.func @transform_10(%arg0: i32, %arg1: i32) -> (i32, i32, i32) {
    %c0_i32 = arith.constant 0 : i32
    %c0_i32_0 = arith.constant 0 : i32
    return %arg0, %c0_i32, %arg1 : i32, i32, i32
  }
  func.func @transform_11(%arg0: i32, %arg1: i32) -> (i32, i32, i32) {
    %c0_i32 = arith.constant 0 : i32
    %c0_i32_0 = arith.constant 0 : i32
    return %arg0, %c0_i32, %arg1 : i32, i32, i32
  }
}

</mosaic_0001>

<bundles_post_ra>
// kernel: tpu_custom_call.1
= control target key start
LH: loop header
LB: loop body
LE: loop exit
PB: predicated region body
PF: predicated region fallthrough
CT: control target
= control target key end

     0   :  { %s2003_s0 = inlined_call_operand.vmem [shape: f32[32,32], index: 0, kind: input, shape index: {}]   ;;  %s2004_s1 = inlined_call_operand.vmem [shape: f32[32,1], index: 1, kind: input, shape index: {}]   ;;  %s2005_s2 = inlined_call_operand.hbm [shape: f32[32,32], index: 2, kind: input, shape index: {}]   ;;  %s2006_s3 = inlined_call_operand.hbm [shape: f32[32,32], index: 3, kind: input, shape index: {}]   ;;  %s2007_s4 = inlined_call_operand.vmem [shape: f32[32,1], index: 4, kind: input, shape index: {}]   ;;  %s2008_s5 = inlined_call_operand.vmem [shape: f32[32,1], index: 5, kind: input, shape index: {}]   ;;  %s2009_s6 = inlined_call_operand.vmem [shape: f32[2,32,1], index: 6, kind: input, shape index: {}]   ;;  %s2010_s7 = inlined_call_operand.vmem [shape: f32[2,32,128], index: 7, kind: input, shape index: {}]   ;;  %s2011_s8 = inlined_call_operand.vmem [shape: f32[2,32,128], index: 8, kind: input, shape index: {}]   ;;  %s2012_s9 = inlined_call_operand.hbm [shape: f32[2,32,128], index: 9, kind: input, shape index: {}]   ;;  %s2013_s10 = inlined_call_operand.hbm [shape: f32[2,32,128], index: 10, kind: output, shape index: {0}]   ;;  %s2014_s11 = inlined_call_operand.hbm [shape: f32[2,1,128], index: 11, kind: output, shape index: {1}]  }
   0x1   :  { %2028 = sst [smem:[#allocation20_spill]] %s2005_s2 }
   0x2   :  { %2029 = sst [smem:[#allocation21_spill]] %s2006_s3 }
   0x3   :  { %2030 = sst [smem:[#allocation22_spill]] %s2008_s5 }
   0x4   :  { %2031 = sst [smem:[#allocation23_spill]] %s2009_s6 }
   0x5   :  { %2032 = sst [smem:[#allocation24_spill]] %s2013_s10 }
   0x6   :  { %2033 = sst [smem:[#allocation25_spill]] %s2014_s11 }
   0x7   :  { %17 = vsyncpa [#allocation3], 0 }
   0x8   :  { %18 = vsyncpa [#allocation6], 0 }
   0x9   :  { %19 = vsyncpa [#allocation4], 0 }
   0xa   :  { %21 = vsyncpa [#allocation4 + $0x1], 0 }
   0xb   :  { %22 = vsyncpa [#allocation10], 0 }
   0xc   :  { %24 = vsyncpa [#allocation10 + $0x1], 0  ;;  %s1693_s17 = smov 0   ;;  %s1695_s18 = smov 0  }
   0xd   :  { %s1697_s19 = smov 0   ;;  %s1699_s20 = smov 0  }
   0xe   :  { %s1701_s21 = smov 0   ;;  %s1703_s22 = smov 0  }
   0xf LB: > { %2034 = sst [smem:[#allocation16_spill]] %s1601_s17  ;;  %s1724_s23 = sadd.s32 4294967295, %s1621_s22   ;;  %s1621_s22 = sphi %s1703_s22, %s30_s22   ;;  %s1617_s21 = sphi %s1701_s21, %s2069_s21   ;;  %s1613_s20 = sphi %s1699_s20, %s2068_s20   ;;  %s1609_s19 = sphi %s1697_s19, %s2067_s19   ;;  %s1605_s18 = sphi %s1695_s18, %s2066_s18   ;;  %s1601_s17 = sphi %s1693_s17, %s2065_s17  }
  0x10   : > { %2035 = sst [smem:[#allocation17_spill]] %s1621_s22  ;;  %s1204_s24 = sadd.s32 4294967294, %s1621_s22  }
  0x11   : > { %p266_p0 = scmp.ne.s32.totalorder %s1609_s19, %s1605_s18  ;;  %p267_p1 = scmp.eq.s32.totalorder %s1621_s22, 0 }
  0x12   : > { %p272_p2 = scmp.ne.s32.totalorder %s1605_s18, %s1601_s17  ;;  %p2015_p3 = scmp.eq.s32.totalorder %s1724_s23, 0 }
  0x13   : > { %p1733_p4 = por %p267_p1, %p266_p0  ;;  %p298_p5 = scmp.eq.s32.totalorder %s1724_s23, 1 }
  0x14   : > { %p1740_p6 = por %p2015_p3, %p272_p2  ;;  %p304_p7 = scmp.eq.s32.totalorder %s1204_s24, 1 }
  0x15   : > { %p1744_p8 = por %p298_p5, %p266_p0  ;;  %p1205_p9 = scmp.ge.s32.totalorder %s1621_s22, 1 }
  0x16   : > { %p1749_p10 = por %p304_p7, %p272_p2  ;;  %p339_p11 = scmp.lt.s32.totalorder %s1621_s22, 3 }
  0x17   : > { %s2038_s27 = scalar_select %p1744_p8, 1, 0 }
  0x18   : > { %s2040_s28 = scalar_select %p1749_p10, 1, 0 }
  0x19   : > { %2039 = sst [smem:[#allocation18_spill]] %s2038_s27  ;;  %p1754_p12 = pnand %p1205_p9, %p339_p11 }
  0x1a   : > { %2041 = sst [smem:[#allocation19_spill]] %s2040_s28  ;;  %s1623_s30 = smov [#allocation2]  }
  0x1b   : > { %s357_s12 = sshll.u32 %s1623_s30, 4  ;;  %p1334_p13 = pneg %p1754_p12  ;;  %s358_s12 = int_to_ptr.vmem [resolvable:$true] %s357_s12 }
  0x1c   : > { %p1354_p1 = scmp.lt.s32.totalorder %s1621_s22, 2  ;;  %s1624_s15 = smov [#allocation5]  }
  0x1d   : > { %p1764_p5 = pnand %p1334_p13, %p2015_p3  ;;  %s370_s16 = sshll.u32 %s1624_s15, 4  ;;  %s371_s16 = int_to_ptr.vmem [resolvable:$true] %s370_s16 }
  0x1e   : > { %p1770_p2 = pnand %p1354_p1, %p1733_p4  ;;  %s1434_s24 = scalar_lea.vmem %s358_s12, 512 }
  0x1f   : > { %p1425_p7 = pneg %p1764_p5  ;;  %p1435_p9 = scmp.ne.s32.totalorder %s358_s12, %s1434_s24 }
  0x20   : > { %p1442_p0 = scmp.lt.s32.totalorder %s358_s12, %s358_s12  ;;  %p1443_p3 = scmp.lt.s32.totalorder %s1434_s24, %s1434_s24 }
  0x21   : > { %p1437_p11 = pnand %p1435_p9, %p1425_p7 }
  0x22   : > { %p1444_p10 = por %p1443_p3, %p1442_p0 }
  0x23   : > { %p1438_p13 = pneg %p1437_p11 }
  0x25   : > { %p1445_p8 = pnand %p1444_p10, %p1438_p13 }
  0x27   : > { %1448 = shalt.err (!%p1445_p8)
}
  0x28   : > { %s2024_s25 = smov 128   ;;  %s2025_s30 = smov 8  }
  0x29   : > { %s2045_s2 = sld [smem:[#allocation20_spill]]  ;;  %s1460_s17 = scalar_lea.vmem %s371_s16, 512 }
  0x2a   : > { %p1461_p4 = scmp.ne.s32.totalorder %s371_s16, %s1460_s17  ;;  %p1468_p10 = scmp.lt.s32.totalorder %s371_s16, %s371_s16 }
  0x2b   : > { %p1469_p8 = scmp.lt.s32.totalorder %s1460_s17, %s1460_s17 }
  0x2c   : > { %p1463_p1 = pnand %p1461_p4, %p1425_p7 }
  0x2d   : > { %p1470_p0 = por %p1469_p8, %p1468_p10 }
  0x2e   : > { %p1464_p3 = pneg %p1463_p1 }
  0x2f   : > { %1337 = dma.hbm_to_vmem [thread:$0]  (!%p1764_p5), %s2045_s2, 512, %s358_s12, [#allocation3], %s2024_s25, %s2024_s25, %s2025_s30  }
  0x30   : > { %p1471_p9 = pnand %p1470_p0, %p1464_p3 }
  0x32   : > { %1474 = shalt.err (!%p1471_p9)
}
  0x33   : > { %s2046_s3 = sld [smem:[#allocation21_spill]]  ;;  %s259_s17 = sadd.s32 1, %s1609_s19 }
  0x34   : > { %s42_s28 = sadd.s32 1, %s1617_s21  ;;  %s420_s12 = sand.u32 1, %s1621_s22  }
  0x35   : > { %p44_p7 = scmp.ge.s32.totalorder %s42_s28, 2  ;;  %s422_s13 = sand.u32 1, %s1609_s19  }
  0x36   : > { %s1241_s15 = sshll.u32 %s1617_s21, 9  ;;  %s1209_s2 = sshll.u32 %s422_s13, 5 }
  0x37   : > { %s2071_s28 = smov (%p44_p7, %s42_s28), 0  ;;  %s431_s10 = scalar_lea.hbm %s2012_s9, %s1241_s15 }
  0x38   : > { %s254_s27 = ssub.s32 %s1617_s21, %s2071_s28  ;;  %s424_s5 = scalar_lea.vmem [#allocation7], %s1209_s2 }
  0x39   : > { %1340 = dma.hbm_to_vmem [thread:$0]  (!%p1764_p5), %s2046_s3, 512, %s371_s16, [#allocation6], %s2024_s25, %s2024_s25, %s2025_s30  }
  0x3a   : > { %p257_p11 = scmp.eq.s32.totalorder %s254_s27, 0  ;;  %s432_s6 = sshll.u32 %s424_s5, 4  ;;  %s433_s6 = int_to_ptr.vmem [resolvable:$true] %s432_s6 }
  0x3b   : > { %s421_s25 = scalar_lea.sflag [#allocation3], %s420_s12  ;;  %p1477_p5 = pneg %p1770_p2 }
  0x3c   : > { %s1811_s16 = scalar_select %p257_p11, %s1609_s19, %s259_s17  }
  0x3d   : > { %s1488_s30 = scalar_lea.vmem %s433_s6, 512  ;;  %s1627_s3 = smov [#allocation7]  }
  0x3e   : > { %p1489_p13 = scmp.ne.s32.totalorder %s433_s6, %s1488_s30  ;;  %s1493_s13 = sshll.u32 %s1627_s3, 4  ;;  %s1494_s13 = int_to_ptr.vmem [resolvable:$false] %s1493_s13 }
  0x3f   : > { %s1495_s22 = scalar_lea.vmem %s1494_s13, 1024  ;;  %p1496_p3 = scmp.lt.s32.totalorder %s433_s6, %s1494_s13 }
  0x40   : > { %p1491_p4 = pnand %p1489_p13, %p1477_p5  ;;  %p1497_p10 = scmp.lt.s32.totalorder %s1495_s22, %s1488_s30 }
  0x42   : > { %p1492_p1 = pneg %p1491_p4  ;;  %p1498_p8 = por %p1497_p10, %p1496_p3 }
  0x44   : > { %p1499_p0 = pnand %p1498_p8, %p1492_p1 }
  0x46   : > { %1502 = shalt.err (!%p1499_p0)
}
  0x47   : > { %s2047_s2 = smov 8   ;;  %s2048_s5 = smov 128  }
  0x48   : > { %1344 = dma.hbm_to_vmem [thread:$0]  (!%p1770_p2), %s431_s10, 512, %s433_s6, %s421_s25, %s2048_s5, %s2048_s5, %s2047_s2  }
  0x49   : > { %444 = sbr.rel (%p1754_p12) target bundleno = 372 (0x174), region = 60  ;;  %p2049_p9 = scmp.eq.s32.totalorder (!%p1754_p12), %s1724_s23, 0 }
  0x4e   : > { %1580 = dma.done.wait (%p2049_p9), [#allocation3], 512   ;;  %p2050_p7 = pmov %p2049_p9 }
  0x50   : > { %1582 = vsyncadd (%p2050_p7), [#allocation3], 4294966784  ;;  %p2051_p11 = pmov %p2050_p7 }
  0x51   : > { %p2052_p5 = pmov %p2050_p7 }
  0x52   : > { %1584 = dma.done.wait (%p2051_p11), [#allocation6], 512  }
  0x53   : > { %1586 = vsyncadd (%p2052_p5), [#allocation6], 4294966784  ;;  %s454_s3 = sand.u32 1, %s1724_s23   ;;  %s1832_s6 = sand.u32 1, %s1605_s18  }
  0x54   : > { %s1215_s10 = sshll.u32 %s1832_s6, 5  ;;  %s455_s22 = scalar_lea.sflag [#allocation3], %s454_s3 }
  0x55   : > { %s1837_s27 = scalar_lea.vmem [#allocation7], %s1215_s10 }
  0x56   : > { %1588 = dma.done.wait (%p1740_p6), %s455_s22, 512  }
  0x57   : > { %1590 = vsyncadd (%p1740_p6), %s455_s22, 4294966784  ;;  %p522_p12 = scmp.lt.s32.totalorder %s1613_s20, 1  ;;  %v1628_v0 = vmov 0   ;;  %v543_v9 = vld [vmem:[%s2003_s0] sm:$0xff]  ;;  %vm575_vm0 = vcmask 261120   ;;  %v544_v11 = vld [vmem:[%s2003_s0 + $0x8] sm:$0xff] }
  0x58   : > { %1413 = vset.pattern.permute.xlu0 %v1628_v0  ;;  %1414 = vset.pattern.permute.xlu1 %v1628_v0  ;;  %v673_v10 = vld [vmem:[#allocation2] sm:$0xff]  ;;  %v674_v12 = vld [vmem:[#allocation2 + $0x8] sm:$0xff]  ;;  %v809_v13 = vld [vmem:[%s1837_s27 + $0x18] sm:$0xff]  ;;  %s2053_s3 = sld [smem:[#allocation23_spill]]  ;;  %s515_s5 = scalar_lea.vmem [#allocation8], %s1215_s10 }
  0x59   : > { %s523_s23 = scalar_select %p522_p12, %s1613_s20, 1  ;;  %1278 = vmatprep.mubr.msk.f32.mxu0 %vm575_vm0, %v543_v9  ;;  %1292 = vmatprep.mubr.msk.f32.mxu1 %vm575_vm0, %v673_v10  ;;  %v808_v14 = vld [vmem:[%s1837_s27 + $0x10] sm:$0xff]  ;;  %v546_v17 = vld [vmem:[%s2003_s0 + $0x18] sm:$0xff]  ;;  %v807_v19 = vld [vmem:[%s1837_s27 + $0x8] sm:$0xff] }
  0x5a   : > { %v545_v15 = vld [vmem:[%s2003_s0 + $0x10] sm:$0xff]  ;;  %v676_v18 = vld [vmem:[#allocation2 + $0x18] sm:$0xff]  ;;  %v806_v20 = vld [vmem:[%s1837_s27] sm:$0xff]  ;;  %s2054_s17 = sld [smem:[#allocation22_spill]] }
  0x5b   : > { %s1845_s29 = sshll.u32 %s523_s23, 5  ;;  %v675_v16 = vld [vmem:[#allocation2 + $0x10] sm:$0xff]  ;;  %v802_v21 = vld [vmem:[#allocation5] sm:$0xff]  ;;  %v803_v23 = vld [vmem:[#allocation5 + $0x8] sm:$0xff]  ;;  %s2056_s23 = sld [smem:[#allocation18_spill]] }
  0x5c   : > { %s534_s30 = scalar_lea.vmem %s2010_s7, %s1845_s29  ;;  %s542_s26 = scalar_lea.vmem %s2011_s8, %s1845_s29  ;;  %v804_v22 = vld [vmem:[#allocation5 + $0x10] sm:$0xff]  ;;  %v805_v24 = vld [vmem:[#allocation5 + $0x18] sm:$0xff]  ;;  %v551_v25 = vld [vmem:[%s2004_s1] sm:$0xff] }
  0x5d   : > { %v550_v1 = vld [vmem:[%s534_s30 + $0x18] sm:$0xff]  ;;  %v549_v3 = vld [vmem:[%s534_s30 + $0x10] sm:$0xff]  ;;  %v548_v5 = vld [vmem:[%s534_s30 + $0x8] sm:$0xff]  ;;  %557 = vperm.xlu0 %1413, %v551_v25   ;;  %s2057_s25 = sld [smem:[#allocation24_spill]] }
  0x5e   : > { %v680_v2 = vld [vmem:[%s542_s26 + $0x18] sm:$0xff]  ;;  %1270 = vmatprep.subr.mxu0 %v550_v1  ;;  %v679_v4 = vld [vmem:[%s542_s26 + $0x10] sm:$0xff]  ;;  %v678_v6 = vld [vmem:[%s542_s26 + $0x8] sm:$0xff]  ;;  %s526_s22 = scalar_lea.vmem %s2053_s3, %s1845_s29  ;;  %s1008_s3 = sshll.u32 %s515_s5, 4  ;;  %s1930_s3 = int_to_ptr.vmem [resolvable:$true] %s1008_s3 }
  0x5f   : > { %1284 = vmatprep.subr.mxu1 %v680_v2  ;;  %1271 = vmatpush3.msra.mxu0 %v550_v1  ;;  %v547_v7 = vld [vmem:[%s534_s30] sm:$0xff]  ;;  %v552_v27 = vld [vmem:[%s2004_s1 + $0x8] sm:$0xff]  ;;  %v553_v29 = vld [vmem:[%s2004_s1 + $0x10] sm:$0xff]  ;;  %s990_s29 = scalar_lea.sflag [#allocation4], %s1832_s6  ;;  %s1503_s27 = scalar_lea.vmem %s1930_s3, 512 }
  0x60   : > { %1285 = vmatpush3.msra.mxu1 %v680_v2  ;;  %1272 = vmatprep.subr.mxu0 %v549_v3  ;;  %v677_v8 = vld [vmem:[%s542_s26] sm:$0xff]  ;;  %v682_v28 = vld [vmem:[%s2007_s4 + $0x8] sm:$0xff]  ;;  %v683_v30 = vld [vmem:[%s2007_s4 + $0x10] sm:$0xff]  ;;  %s2055_s12 = smov %s2054_s17  ;;  %p1504_p6 = scmp.ne.s32.totalorder %s1930_s3, %s1503_s27 }
  0x61   : > { %1286 = vmatprep.subr.mxu1 %v679_v4  ;;  %1273 = vmatpush3.msra.mxu0 %v549_v3  ;;  %v681_v26 = vld [vmem:[%s2007_s4] sm:$0xff]  ;;  %v912_v32 = vld [vmem:[%s526_s22 + $0x8] sm:$0xff]  ;;  %v554_v33 = vld [vmem:[%s2004_s1 + $0x18] sm:$0xff]  ;;  %p2058_p2 = scmp.ne.s32.totalorder %s2056_s23, 0 }
  0x62   : > { %1287 = vmatpush3.msra.mxu1 %v679_v4  ;;  %1274 = vmatprep.subr.mxu0 %v548_v5  ;;  %v911_v31 = vld [vmem:[%s526_s22] sm:$0xff]  ;;  %v684_v34 = vld [vmem:[%s2007_s4 + $0x18] sm:$0xff]  ;;  %v913_v35 = vld [vmem:[%s526_s22 + $0x10] sm:$0xff] }
  0x63   : > { %1288 = vmatprep.subr.mxu1 %v678_v6  ;;  %1275 = vmatpush3.msra.mxu0 %v548_v5  ;;  %v914_v36 = vld [vmem:[%s526_s22 + $0x18] sm:$0xff]  ;;  %v947_v37 = vld [vmem:[%s2054_s17] sm:$0xff]  ;;  %v948_v38 = vld [vmem:[%s2055_s12 + $0x8] sm:$0xff]  ;;  %s1245_s22 = sshll.u32 %s1613_s20, 9  ;;  %p1505_p13 = pnand %p1504_p6, %p2058_p2 }
  0x64   : > { %1289 = vmatpush3.msra.mxu1 %v678_v6  ;;  %1276 = vmatprep.subr.mxu0 %v547_v7  ;;  %v949_v39 = vld [vmem:[%s2055_s12 + $0x10] sm:$0xff]  ;;  %v950_v40 = vld [vmem:[%s2055_s12 + $0x18] sm:$0xff]  ;;  %s1935_s30 = scalar_lea.hbm %s2057_s25, %s1245_s22  ;;  %s1629_s17 = smov [#allocation8]  }
  0x65   : > { %1290 = vmatprep.subr.mxu1 %v677_v8  ;;  %1277 = vmatpush3.msra.mxu0 %v547_v7  ;;  %p1506_p4 = pneg %p1505_p13  ;;  %s1507_s26 = sshll.u32 %s1629_s17, 4  ;;  %s1508_s26 = int_to_ptr.vmem [resolvable:$false] %s1507_s26 }
  0x66   : > { %1291 = vmatpush3.msra.mxu1 %v677_v8  ;;  %1279 = vmatmul.mubr.msk.f32.vlgmr.msra.gmra.mxu0 %vm575_vm0, %v544_v11  ;;  %s1509_s15 = scalar_lea.vmem %s1508_s26, 1024  ;;  %p1510_p1 = scmp.lt.s32.totalorder %s1930_s3, %s1508_s26 }
  0x67   : > { %1293 = vmatmul.mubr.msk.f32.vlgmr.msra.gmra.mxu1 %vm575_vm0, %v674_v12  ;;  %1298 = vmatprep.subr.mxu0 %v809_v13  ;;  %p1511_p3 = scmp.lt.s32.totalorder %s1509_s15, %s1503_s27 }
  0x68   : > { %1312 = vmatprep.subr.mxu1 %v809_v13  ;;  %1299 = vmatpush3.msra.mxu0 %v809_v13 }
  0x69   : > { %1316 = vmatpush3.msra.mxu1 %v809_v13  ;;  %1300 = vmatprep.subr.mxu0 %v808_v14  ;;  %p1512_p10 = por %p1511_p3, %p1510_p1 }
  0x6a   : > { %1313 = vmatprep.subr.mxu1 %v808_v14  ;;  %1281 = vmatprep.mubr.msk.f32.mxu0 %vm575_vm0, %v545_v15 }
  0x6b   : > { %1295 = vmatprep.mubr.msk.f32.mxu1 %vm575_vm0, %v675_v16  ;;  %1301 = vmatpush3.msra.mxu0 %v808_v14  ;;  %p1513_p8 = pnand %p1512_p10, %p1506_p4 }
  0x6c   : > { %1317 = vmatpush3.msra.mxu1 %v808_v14  ;;  %1282 = vmatmul.mubr.msk.f32.gmra.mxu0 %vm575_vm0, %v546_v17 }
  0x6d   : > { %1296 = vmatmul.mubr.msk.f32.gmra.mxu1 %vm575_vm0, %v676_v18  ;;  %1302 = vmatprep.subr.mxu0 %v807_v19 }
  0x6e   : > { %1314 = vmatprep.subr.mxu1 %v807_v19  ;;  %1303 = vmatpush3.msra.mxu0 %v807_v19 }
  0x6f   : > { %1318 = vmatpush3.msra.mxu1 %v807_v19  ;;  %1304 = vmatprep.subr.mxu0 %v806_v20 }
  0x70   : > { %1315 = vmatprep.subr.mxu1 %v806_v20  ;;  %1305 = vmatpush3.msra.mxu0 %v806_v20 }
  0x71   : > { %1319 = vmatpush3.msra.mxu1 %v806_v20  ;;  %1306 = vmatprep.mubr.msk.f32.mxu0 %vm575_vm0, %v802_v21 }
  0x72   : > { %1309 = vmatprep.mubr.msk.f32.mxu1 %vm575_vm0, %v804_v22  ;;  %1307 = vmatmul.mubr.msk.f32.vlgmr.msra.gmra.mxu0 %vm575_vm0, %v803_v23 }
  0x73   : > { %1310 = vmatmul.mubr.msk.f32.vlgmr.msra.gmra.mxu1 %vm575_vm0, %v805_v24  ;;  %687 = vperm.xlu1 %1414, %v681_v26  }
  0x74   : > { %562 = vperm.xlu0 %1413, %v552_v27  }
  0x77   : > { %692 = vperm.xlu1 %1414, %v682_v28  }
  0x78   : > { %567 = vperm.xlu0 %1413, %v553_v29  }
  0x7b   : > { %697 = vperm.xlu1 %1414, %v683_v30  }
  0x7c   : > { %917 = vperm.xlu0 %1413, %v911_v31  }
  0x7f   : > { %922 = vperm.xlu1 %1414, %v912_v32  }
  0x80   : > { %572 = vperm.xlu0 %1413, %v554_v33  }
  0x83   : > { %702 = vperm.xlu1 %1414, %v684_v34  }
  0x84   : > { %927 = vperm.xlu0 %1413, %v913_v35  }
  0x87   : > { %932 = vperm.xlu1 %1414, %v914_v36  }
  0x88   : > { %953 = vperm.xlu0 %1413, %v947_v37  }
  0x8b   : > { %958 = vperm.xlu1 %1414, %v948_v38  }
  0x8c   : > { %963 = vperm.xlu0 %1413, %v949_v39  }
  0x8f   : > { %968 = vperm.xlu1 %1414, %v950_v40  }
  0xd8   : > { %v558_v41 = vpop.permute.xlu0 %557 }
  0xee   : > { %v1923_v42 = vpop.permute.xlu1 %687 }
  0xef   : > { %v563_v43 = vpop.permute.xlu0 %562 }
  0xf2   : > { %v693_v44 = vpop.permute.xlu1 %692 }
  0xf3   : > { %v568_v45 = vpop.permute.xlu0 %567 }
  0xf6   : > { %v698_v46 = vpop.permute.xlu1 %697 }
  0xf7   : > { %v1925_v47 = vpop.permute.xlu0 %917 }
  0xfa   : > { %v923_v50 = vpop.permute.xlu1 %922 }
  0xfb   : > { %v573_v55 = vpop.permute.xlu0 %572 }
  0xfe   : > { %v703_v58 = vpop.permute.xlu1 %702 }
 0x126   : > { %v1280_v48 = vpop.f32.mrf.mxu0 }
 0x127   : > { %v1294_v49 = vpop.f32.mrf.mxu1  ;;  %v660_v51 = vadd.f32 %v1280_v48, %v563_v43 }
 0x128   : > { %v654_v52 = vpop.f32.mrf.mxu0  ;;  %v789_v63 = vadd.f32 %v1294_v49, %v693_v44 }
 0x129   : > { %v783_v53 = vpop.f32.mrf.mxu1  ;;  %985 = vst [vmem:[%s515_s5 + $0x8] sm:$0xff] %v660_v51  ;;  %v655_v54 = vadd.f32 %v654_v52, %v558_v41  ;;  %v936_v1 = vadd.f32 %v923_v50, %v660_v51 }
 0x12b   : > { %984 = vst [vmem:[%s515_s5] sm:$0xff] %v655_v54 }
 0x12c   : > { %v1283_v56 = vpop.f32.mrf.mxu0 }
 0x12d   : > { %v1297_v57 = vpop.f32.mrf.mxu1  ;;  %v670_v59 = vadd.f32 %v1283_v56, %v573_v55 }
 0x12e   : > { %v664_v60 = vpop.f32.mrf.mxu0  ;;  %v799_v0 = vadd.f32 %v1297_v57, %v703_v58 }
 0x12f   : > { %v793_v61 = vpop.f32.mrf.mxu1  ;;  %987 = vst [vmem:[%s515_s5 + $0x18] sm:$0xff] %v670_v59  ;;  %v665_v62 = vadd.f32 %v664_v60, %v568_v45 }
 0x131   : > { %986 = vst [vmem:[%s515_s5 + $0x10] sm:$0xff] %v665_v62 }
 0x132   : > { %v1308_v2 = vpop.f32.mrf.mxu0 }
 0x133   : > { %v1311_v3 = vpop.f32.mrf.mxu1 }
 0x134   : > { %1516 = shalt.err (!%p1513_p8)
}
 0x135   : > { %s1517_s11 = scalar_lea.hbm %s1935_s30, 512  ;;  %s1521_s2 = scalar_lea.hbm %s2057_s25, 1024 }
 0x136   : > { %p1518_p0 = scmp.ne.s32.totalorder %s1935_s30, %s1517_s11  ;;  %p1522_p11 = scmp.lt.s32.totalorder %s1935_s30, %s2057_s25 }
 0x137   : > { %p1523_p5 = scmp.lt.s32.totalorder %s1521_s2, %s1517_s11 }
 0x138   : > { %p1519_p9 = pnand %p1518_p0, %p2058_p2 }
 0x139   : > { %p1524_p12 = por %p1523_p5, %p1522_p11 }
 0x13a   : > { %p1520_p7 = pneg %p1519_p9 }
 0x13c   : > { %p1525_p6 = pnand %p1524_p12, %p1520_p7 }
 0x13e   : > { %1528 = shalt.err (!%p1525_p6)
}
 0x13f   : > { %s1630_s14 = smov 128   ;;  %s1631_s10 = smov 8   ;;  %v928_v4 = vpop.permute.xlu0 %927  ;;  %v933_v5 = vpop.permute.xlu1 %932  ;;  %v784_v6 = vadd.f32 %v783_v53, %v1923_v42  ;;  %v794_v7 = vadd.f32 %v793_v61, %v698_v46  ;;  %v908_v8 = vadd.f32 %v1308_v2, %v789_v63  ;;  %v910_v9 = vadd.f32 %v1311_v3, %v799_v0 }
 0x140   : > { %1330 = dma.vmem_to_hbm [thread:$0]  (%p2058_p2), %s1930_s3, 512, %s1935_s30, %s990_s29, %s1630_s14, %s1630_s14, %s1631_s10   ;;  %v935_v10 = vadd.f32 %v1925_v47, %v655_v54  ;;  %v938_v11 = vadd.f32 %v933_v5, %v670_v59  ;;  %v888_v12 = vpop.f32.mrf.mxu0  ;;  %v898_v13 = vpop.f32.mrf.mxu1  ;;  %v937_v14 = vadd.f32 %v928_v4, %v665_v62 }
 0x141   : > { %v940_v15 = vadd.f32 %v936_v1, %v908_v8  ;;  %v907_v16 = vadd.f32 %v888_v12, %v784_v6  ;;  %v909_v17 = vadd.f32 %v898_v13, %v794_v7  ;;  %s1238_s3 = sshll.u32 %s1613_s20, 4  ;;  %s521_s30 = scalar_lea.vmem [#allocation9], %s1832_s6 }
 0x142   : > { %v942_v18 = vadd.f32 %v938_v11, %v910_v9  ;;  %s1025_s29 = sshll.u32 %s521_s30, 4  ;;  %s2059_s26 = sld [smem:[#allocation25_spill]]  ;;  %s1026_s29 = int_to_ptr.vmem [resolvable:$true] %s1025_s29 }
 0x143   : > { %1415 = vtanh.f32 %v940_v15  ;;  %v939_v19 = vadd.f32 %v935_v10, %v907_v16  ;;  %v941_v20 = vadd.f32 %v937_v14, %v909_v17  ;;  %v954_v21 = vpop.permute.xlu0 %953  ;;  %v959_v23 = vpop.permute.xlu1 %958  ;;  %s995_s11 = scalar_lea.sflag [#allocation10], %s1832_s6  ;;  %s1529_s24 = scalar_lea.vmem %s1026_s29, 16 }
 0x144   : > { %p1530_p13 = scmp.ne.s32.totalorder %s1026_s29, %s1529_s24  ;;  %s1632_s13 = smov [#allocation9]  }
 0x145   : > { %1417 = vtanh.f32 %v939_v19  ;;  %s1533_s2 = sshll.u32 %s1632_s13, 4  ;;  %s1534_s2 = int_to_ptr.vmem [resolvable:$false] %s1533_s2 }
 0x146   : > { %1419 = vtanh.f32 %v941_v20  ;;  %p1531_p4 = pnand %p1530_p13, %p2058_p2  ;;  %s1535_s20 = scalar_lea.vmem %s1534_s2, 32 }
 0x147   : > { %1421 = vtanh.f32 %v942_v18  ;;  %v964_v29 = vpop.permute.xlu0 %963  ;;  %v969_v32 = vpop.permute.xlu1 %968  ;;  %p1536_p3 = scmp.lt.s32.totalorder %s1026_s29, %s1534_s2  ;;  %p1537_p10 = scmp.lt.s32.totalorder %s1535_s20, %s1529_s24 }
 0x148   : > { %s1023_s15 = scalar_lea.hbm %s2059_s26, %s1238_s3  ;;  %p1532_p1 = pneg %p1531_p4 }
 0x149   : > { %p1538_p8 = por %p1537_p10, %p1536_p3 }
 0x14b   : > { %p1539_p0 = pnand %p1538_p8, %p1532_p1 }
 0x150   : > { %v1416_v22 = vpop.eup %1415 }
 0x151   : > { %v972_v26 = vmul.f32 %v1416_v22, %v959_v23 }
 0x152   : > { %v1418_v24 = vpop.eup %1417 }
 0x153   : > { %v1420_v25 = vpop.eup %1419  ;;  %v971_v27 = vmul.f32 %v1418_v24, %v954_v21 }
 0x154   : > { %v1422_v28 = vpop.eup %1421  ;;  %v973_v31 = vmul.f32 %v1420_v25, %v964_v29 }
 0x155   : > { %v975_v30 = vadd.f32 %v972_v26, %v971_v27  ;;  %v974_v33 = vmul.f32 %v1422_v28, %v969_v32 }
 0x157   : > { %v976_v34 = vadd.f32 %v975_v30, %v973_v31 }
 0x159   : > { %v977_v35 = vadd.f32 %v976_v34, %v974_v33 }
 0x15b   : > { %v978_v36 = vrot.slane %v977_v35, 4 }
 0x15d   : > { %v979_v37 = vadd.f32 %v978_v36, %v977_v35 }
 0x15f   : > { %v980_v38 = vrot.slane %v979_v37, 2 }
 0x161   : > { %v981_v39 = vadd.f32 %v980_v38, %v979_v37 }
 0x163   : > { %v982_v40 = vrot.slane %v981_v39, 1 }
 0x165   : > { %v983_v41 = vadd.f32 %v982_v40, %v981_v39 }
 0x167   : > { %988 = vst [vmem:[%s521_s30] sm:$0x1] %v983_v41 }
 0x168   : > { %1542 = shalt.err (!%p1539_p0)
}
 0x169   : > { %s1543_s5 = scalar_lea.hbm %s1023_s15, 16  ;;  %s1547_s14 = scalar_lea.hbm %s2059_s26, 32 }
 0x16a   : > { %p1544_p9 = scmp.ne.s32.totalorder %s1023_s15, %s1543_s5  ;;  %p1548_p5 = scmp.lt.s32.totalorder %s1023_s15, %s2059_s26 }
 0x16b   : > { %p1549_p12 = scmp.lt.s32.totalorder %s1547_s14, %s1543_s5 }
 0x16c   : > { %p1545_p7 = pnand %p1544_p9, %p2058_p2 }
 0x16d   : > { %p1550_p6 = por %p1549_p12, %p1548_p5 }
 0x16e   : > { %p1546_p11 = pneg %p1545_p7 }
 0x170   : > { %p1551_p13 = pnand %p1550_p6, %p1546_p11 }
 0x172   : > { %1554 = shalt.err (!%p1551_p13)
}
 0x173   : > { %1331 = dma.vmem_to_hbm [thread:$0]  (%p2058_p2), %s1026_s29, 16, %s1023_s15, %s995_s11  }
 0x174 PF: > { %s2060_s30 = sld [smem:[#allocation16_spill]] }
 0x175   : > { %s2061_s27 = sld [smem:[#allocation19_spill]] }
 0x176   : > { %s2062_s17 = sld [smem:[#allocation17_spill]] }
 0x17a   : > { %s1037_s24 = sand.u32 1, %s2060_s30  }
 0x17b   : > { %p2063_p4 = scmp.ne.s32.totalorder %s2061_s27, 0  ;;  %s1038_s13 = scalar_lea.sflag [#allocation4], %s1037_s24 }
 0x17c   : > { %p2064_p1 = scmp.ge.s32.totalorder %s2062_s17, 2 }
 0x17e   : > { %p1346_p3 = pnand %p2064_p1, %p2063_p4 }
 0x180   : > { %p1347_p10 = pneg %p1346_p3 }
 0x182   : > { %1592 = dma.done.wait (%p1347_p10), %s1038_s13, 512  }
 0x183   : > { %1594 = vsyncadd (%p1347_p10), %s1038_s13, 4294966784  ;;  %s1047_s2 = scalar_lea.sflag [#allocation10], %s1037_s24 }
 0x184   : > { %1596 = dma.done.wait (%p1347_p10), %s1047_s2, 16  }
 0x185   : > { %1598 = vsyncadd (%p1347_p10), %s1047_s2, 4294967280  ;;  %s30_s22 = sadd.s32 1, %s2062_s17   ;;  %s2065_s17 = smov %s1605_s18 }
 0x186   : > { %p27_p8 = scmp.ge.s32.totalorder %s30_s22, 4   ;;  %s2066_s18 = smov %s1609_s19 }
 0x187   : > { %s2067_s19 = smov %s1811_s16  ;;  %s2068_s20 = smov %s1617_s21 }
 0x188   : > { %s2069_s21 = smov %s2071_s28  ;;  %29 = sbr.rel (!%p27_p8) target bundleno = 15 (0xf), region = 138 }
 0x18d   :  { %1051 = vsyncpa [#allocation3], 1 }
 0x18e   :  { %1053 = vsyncpa [#allocation3 + $0x1], 1 }
 0x18f   :  { %1054 = vsyncpa [#allocation6], 1 }
 0x190   :  { %1055 = vsyncpa [#allocation4], 1 }
 0x191   :  { %1057 = vsyncpa [#allocation4 + $0x1], 1 }
 0x192   :  { %1058 = vsyncpa [#allocation10], 1 }
 0x193   :  { %1060 = vsyncpa [#allocation10 + $0x1], 1 }

</bundles_post_ra>
